<compile_context>
chip_gen: v7x
topology: tpu7x:2x2x1
jax: 0.10.0
libtpu: 0.0.40
codegen_flags: <defaults>
</compile_context>

<pallas_src>
import functools

import jax
import jax.numpy as jnp
from jax.experimental import pallas as pl
from jax.experimental.pallas import tpu as pltpu


def _round_up(x, m):
    return ((x + m - 1) // m) * m


def mlp_kernel(x_ref, w1_ref, b1_ref, w2_ref, b2_ref, o_ref):
    # projection: Linear(in_dim, hidden) -> f32 accumulation on the MXU
    h = jnp.dot(x_ref[...], w1_ref[...], preferred_element_type=jnp.float32)
    h = h + b1_ref[...]                       # (bm, H) + (1, H), f32
    # LeakyReLU (torch default negative_slope=0.01): single VALU max
    h = jnp.maximum(h, 0.01 * h)
    # head: Linear(hidden, nn_classes_padded); tiny, but fused so h never
    # leaves VMEM. Cast h to the weight dtype for the MXU, accumulate in f32.
    o = jnp.dot(h.astype(w2_ref.dtype), w2_ref[...],
                preferred_element_type=jnp.float32)
    o_ref[...] = (o + b2_ref[...]).astype(o_ref.dtype)


@functools.partial(jax.jit, static_argnames=("bm", "compute_dtype"))
def mlp_forward(x, w1, b1, w2, b2, *, bm=256, compute_dtype=jnp.bfloat16):
    """y = (leaky_relu(x @ w1 + b1)) @ w2 + b2, returned in float32.

    x:  (B, IN)      w1: (IN, H)   b1: (1, H)
    w2: (H, OUT)     b2: (1, OUT)
    Weights are stored (in_features, out_features), i.e. the transpose of
    torch.nn.Linear.weight, so the kernel does x @ W with no transpose.
    """
    B, IN = x.shape
    H = w1.shape[1]
    OUT = w2.shape[1]
    OUT_PAD = _round_up(OUT, 128)             # lane-dense output slab

    # Clamp / align the batch tile: multiple of 8 (f32 sublane rule also holds
    # for bf16 tiles here), never larger than the (rounded-up) batch.
    bm = max(8, min(_round_up(bm, 8), _round_up(B, 8)))

    c_bytes = jnp.dtype(compute_dtype).itemsize

    # Cast the MXU operands; keep biases (VPU work) in f32.
    xc = x.astype(compute_dtype)
    w1c = w1.astype(compute_dtype)
    b1f = b1.astype(jnp.float32).reshape(1, H)
    w2p = jnp.zeros((H, OUT_PAD), compute_dtype).at[:, :OUT].set(
        w2.astype(compute_dtype))
    b2p = jnp.zeros((1, OUT_PAD), jnp.float32).at[:, :OUT].set(
        b2.astype(jnp.float32).reshape(1, OUT))

    # Per-step VMEM footprint (inputs/outputs are double-buffered by Pallas),
    # plus headroom for the f32 intermediate h and register spill slack.
    vmem_bytes = (
        2 * bm * IN * c_bytes            # x tiles
        + 2 * bm * OUT_PAD * 4           # output tiles (f32)
        + 2 * IN * H * c_bytes           # W1
        + 2 * H * OUT_PAD * c_bytes      # W2 (padded)
        + 2 * (H + OUT_PAD) * 4          # biases
        + 2 * bm * max(H, OUT_PAD) * 4   # h / o intermediates
    )
    vmem_limit = min(int(vmem_bytes * 2) + (4 << 20), 64 << 20)

    cost = pl.CostEstimate(
        flops=2 * B * (IN * H + H * OUT_PAD),
        transcendentals=0,
        bytes_accessed=(xc.size * c_bytes + w1c.size * c_bytes
                        + w2p.size * c_bytes + b1f.size * 4 + b2p.size * 4
                        + B * OUT_PAD * 4),
    )

    out = pl.pallas_call(
        mlp_kernel,
        out_shape=jax.ShapeDtypeStruct((B, OUT_PAD), jnp.float32),
        grid_spec=pltpu.PrefetchScalarGridSpec(
            num_scalar_prefetch=0,
            grid=(pl.cdiv(B, bm),),
            in_specs=[
                pl.BlockSpec((bm, IN), lambda i: (i, 0)),       # x tile (streamed)
                pl.BlockSpec((IN, H), lambda i: (0, 0)),        # W1 (resident)
                pl.BlockSpec((1, H), lambda i: (0, 0)),         # b1
                pl.BlockSpec((H, OUT_PAD), lambda i: (0, 0)),   # W2 (resident, padded)
                pl.BlockSpec((1, OUT_PAD), lambda i: (0, 0)),   # b2 (padded)
            ],
            out_specs=pl.BlockSpec((bm, OUT_PAD), lambda i: (i, 0)),
        ),
        compiler_params=pltpu.CompilerParams(
            dimension_semantics=("parallel",),
            vmem_limit_bytes=vmem_limit,
        ),
        cost_estimate=cost,
    )(xc, w1c, b1f, w2p, b2p)

    return out[:, :OUT]


def init_linear(key, fan_in, fan_out, dtype=jnp.float32):
    # Matches torch.nn.Linear default init: U(-1/sqrt(fan_in), 1/sqrt(fan_in)).
    kw, kb = jax.random.split(key)
    bound = 1.0 / (fan_in ** 0.5)
    w = jax.random.uniform(kw, (fan_in, fan_out), dtype, -bound, bound)
    b = jax.random.uniform(kb, (1, fan_out), dtype, -bound, bound)
    return w, b


if __name__ == "__main__":
    # Small-shape analogue of the module: embedding_length = 64
    # (real protbert path would be MAX_LEN*2 = 1024 -> in_dim 2048, hidden 512).
    embedding_length = 64
    in_dim = embedding_length * 2        # projection input:   128
    hidden = embedding_length // 2       # classification dim:  32
    nn_classes = 2
    batch = 64                           # with bm=32 -> 2 grid blocks (v7x megacore)

    key = jax.random.PRNGKey(0)
    kx, k1, k2 = jax.random.split(key, 3)

    x = jax.random.normal(kx, (batch, in_dim), jnp.float32)
    w1, b1 = init_linear(k1, in_dim, hidden)
    w2, b2 = init_linear(k2, hidden, nn_classes)

    # Pure-JAX f32 reference.
    h_ref = x @ w1 + b1
    h_ref = jnp.where(h_ref > 0, h_ref, 0.01 * h_ref)
    ref = h_ref @ w2 + b2

    # 1) Exact-precision path (f32 operands): tight tolerance.
    out_f32 = mlp_forward(x, w1, b1, w2, b2, bm=32, compute_dtype=jnp.float32)
    out_f32 = jax.block_until_ready(out_f32)
    assert out_f32.shape == (batch, nn_classes)
    assert jnp.allclose(out_f32, ref, atol=1e-5, rtol=1e-5)

    # 2) Default fast path (bf16 operands, f32 accumulation): loose tolerance.
    out_bf16 = mlp_forward(x, w1, b1, w2, b2, bm=32)
    out_bf16 = jax.block_until_ready(out_bf16)
    assert out_bf16.shape == (batch, nn_classes)
    assert jnp.allclose(out_bf16, ref, atol=2e-2, rtol=2e-2)

    print("KERNEL_OK")
</pallas_src>

<mosaic_0001>
module attributes {stable_mosaic.version = 11 : i64} {
  func.func @mlp_kernel(%arg0: i32, %arg1: memref<32x128xf32, #tpu.memory_space<vmem>>, %arg2: memref<128x32xf32, #tpu.memory_space<vmem>>, %arg3: memref<1x32xf32, #tpu.memory_space<vmem>>, %arg4: memref<32x128xf32, #tpu.memory_space<vmem>>, %arg5: memref<1x128xf32, #tpu.memory_space<vmem>>, %arg6: memref<32x128xf32, #tpu.memory_space<vmem>>) attributes {dimension_semantics = [#tpu.dimension_semantics<parallel>], iteration_bounds = array<i64: 2>, scalar_prefetch = 0 : i64, scratch_operands = 0 : i64, tpu.core_type = #tpu.core_type<tc>, window_params = [{transform_indices = @transform_0, window_bounds = array<i64: 32, 128>}, {pipeline_mode = #tpu.pipeline_mode<synchronous>, transform_indices = @transform_1, window_bounds = array<i64: 128, 32>}, {pipeline_mode = #tpu.pipeline_mode<synchronous>, transform_indices = @transform_2, window_bounds = array<i64: 1, 32>}, {pipeline_mode = #tpu.pipeline_mode<synchronous>, transform_indices = @transform_3, window_bounds = array<i64: 32, 128>}, {pipeline_mode = #tpu.pipeline_mode<synchronous>, transform_indices = @transform_4, window_bounds = array<i64: 1, 128>}, {transform_indices = @transform_5, window_bounds = array<i64: 32, 128>}]} {
    %c0 = arith.constant 0 : index
    %c0_0 = arith.constant 0 : index
    %0 = vector.load %arg1[%c0, %c0_0] : memref<32x128xf32, #tpu.memory_space<vmem>>, vector<32x128xf32>
    %c0_1 = arith.constant 0 : index
    %c0_2 = arith.constant 0 : index
    %1 = vector.load %arg2[%c0_1, %c0_2] : memref<128x32xf32, #tpu.memory_space<vmem>>, vector<128x32xf32>
    %cst = arith.constant dense<0.000000e+00> : vector<32x32xf32>
    %2 = tpu.matmul %0, %1, %cst {dimension_numbers = #tpu.dot_dimension_numbers<[1], [0], [0], [1], [0, 0, 1, 1], [], []>} : vector<32x128xf32>, vector<128x32xf32>, vector<32x32xf32> -> vector<32x32xf32>
    %c0_3 = arith.constant 0 : index
    %c0_4 = arith.constant 0 : index
    %3 = vector.load %arg3[%c0_3, %c0_4] : memref<1x32xf32, #tpu.memory_space<vmem>>, vector<1x32xf32>
    %4 = vector.broadcast %3 : vector<1x32xf32> to vector<32x32xf32>
    %5 = arith.addf %2, %4 : vector<32x32xf32>
    %cst_5 = arith.constant 0.00999999977 : f32
    %6 = vector.broadcast %cst_5 : f32 to vector<32x32xf32>
    %7 = arith.mulf %6, %5 : vector<32x32xf32>
    %8 = arith.maximumf %5, %7 : vector<32x32xf32>
    %c0_6 = arith.constant 0 : index
    %c0_7 = arith.constant 0 : index
    %9 = vector.load %arg4[%c0_6, %c0_7] : memref<32x128xf32, #tpu.memory_space<vmem>>, vector<32x128xf32>
    %cst_8 = arith.constant dense<0.000000e+00> : vector<32x128xf32>
    %10 = tpu.matmul %8, %9, %cst_8 {dimension_numbers = #tpu.dot_dimension_numbers<[1], [0], [0], [1], [0, 0, 1, 1], [], []>} : vector<32x32xf32>, vector<32x128xf32>, vector<32x128xf32> -> vector<32x128xf32>
    %c0_9 = arith.constant 0 : index
    %c0_10 = arith.constant 0 : index
    %11 = vector.load %arg5[%c0_9, %c0_10] : memref<1x128xf32, #tpu.memory_space<vmem>>, vector<1x128xf32>
    %12 = vector.broadcast %11 : vector<1x128xf32> to vector<32x128xf32>
    %13 = arith.addf %10, %12 : vector<32x128xf32>
    %c0_11 = arith.constant 0 : index
    %c0_12 = arith.constant 0 : index
    %14 = vector.load %arg6[%c0_11, %c0_12] : memref<32x128xf32, #tpu.memory_space<vmem>>, vector<32x128xf32>
    tpu.vector_store %arg6[%c0_11, %c0_12], %13 {strides = array<i32>} : memref<32x128xf32, #tpu.memory_space<vmem>>, vector<32x128xf32>,
    return
  }
  func.func @transform_0(%arg0: i32) -> (i32, i32) {
    %c0_i32 = arith.constant 0 : i32
    %c0_i32_0 = arith.constant 0 : i32
    return %arg0, %c0_i32 : i32, i32
  }
  func.func @transform_1(%arg0: i32) -> (i32, i32) {
    %c0_i32 = arith.constant 0 : i32
    %c0_i32_0 = arith.constant 0 : i32
    %c0_i32_1 = arith.constant 0 : i32
    return %c0_i32, %c0_i32_0 : i32, i32
  }
  func.func @transform_2(%arg0: i32) -> (i32, i32) {
    %c0_i32 = arith.constant 0 : i32
    %c0_i32_0 = arith.constant 0 : i32
    %c0_i32_1 = arith.constant 0 : i32
    return %c0_i32, %c0_i32_0 : i32, i32
  }
  func.func @transform_3(%arg0: i32) -> (i32, i32) {
    %c0_i32 = arith.constant 0 : i32
    %c0_i32_0 = arith.constant 0 : i32
    %c0_i32_1 = arith.constant 0 : i32
    return %c0_i32, %c0_i32_0 : i32, i32
  }
  func.func @transform_4(%arg0: i32) -> (i32, i32) {
    %c0_i32 = arith.constant 0 : i32
    %c0_i32_0 = arith.constant 0 : i32
    %c0_i32_1 = arith.constant 0 : i32
    return %c0_i32, %c0_i32_0 : i32, i32
  }
  func.func @transform_5(%arg0: i32) -> (i32, i32) {
    %c0_i32 = arith.constant 0 : i32
    %c0_i32_0 = arith.constant 0 : i32
    return %arg0, %c0_i32 : i32, i32
  }
}

</mosaic_0001>

<bundles_post_ra>
// kernel: mlp_forward.1
= control target key start
LH: loop header
LB: loop body
LE: loop exit
PB: predicated region body
PF: predicated region fallthrough
CT: control target
= control target key end

     0   :  { %s700_s18 = smov 0   ;;  %s796_s0 = inlined_call_operand.vmem [shape: f32[64,128], index: 0, kind: input, shape index: {}]   ;;  %s797_s1 = inlined_call_operand.vmem [shape: f32[128,32], index: 1, kind: input, shape index: {}]   ;;  %s798_s2 = inlined_call_operand.vmem [shape: f32[1,32], index: 2, kind: input, shape index: {}]   ;;  %s799_s3 = inlined_call_operand.vmem [shape: f32[32,128], index: 3, kind: input, shape index: {}]   ;;  %s800_s4 = inlined_call_operand.vmem [shape: f32[1,128], index: 4, kind: input, shape index: {}]   ;;  %s801_s5 = inlined_call_operand.vmem [shape: f32[64,128], index: 5, kind: output, shape index: {}]  }
   0x1 LB: > { %s517_s19 = sadd.s32 4294967295, %s668_s18   ;;  %p521_p0 = scmp.ge.s32.totalorder %s668_s18, 1  ;;  %s668_s18 = sphi %s700_s18, %s15_s18  }
   0x2   : > { %p188_p1 = scmp.lt.s32.totalorder %s668_s18, 3 }
   0x4   : > { %p189_p2 = pnand %p521_p0, %p188_p1 }
   0x5   : > { %v232_v0 = vld [vmem:[%s797_s1] sm:$0xff] (!%p189_p2)  ;;  %v233_v1 = vld [vmem:[%s797_s1 + $0x8] sm:$0xff] (!%p189_p2)  ;;  %v234_v2 = vld [vmem:[%s797_s1 + $0x10] sm:$0xff] (!%p189_p2)  ;;  %s522_s26 = sshll.u32 (!%p189_p2), %s517_s19, 2  ;;  %vm359_vm0 = vcmask (!%p189_p2), 261120  }
   0x6   : > { %192 = sbr.rel (%p189_p2) target bundleno = 480 (0x1e0), region = 40  ;;  %v614_v3 = vpack.c.bf16 (!%p189_p2), %v233_v1, %v232_v0  ;;  %v235_v4 = vld [vmem:[%s797_s1 + $0x18] sm:$0xff] (!%p189_p2)  ;;  %p217_p3 = scmp.lt.s32.totalorder (!%p189_p2), %s522_s26, 7  ;;  %v236_v6 = vld [vmem:[%s797_s1 + $0x20] sm:$0xff] (!%p189_p2)  ;;  %v237_v7 = vld [vmem:[%s797_s1 + $0x28] sm:$0xff] (!%p189_p2) }
   0x7   : > { %v618_v5 = vpack.c.bf16 (!%p189_p2), %v235_v4, %v234_v2  ;;  %v622_v8 = vpack.c.bf16 (!%p189_p2), %v237_v7, %v236_v6  ;;  %v238_v9 = vld [vmem:[%s797_s1 + $0x30] sm:$0xff] (!%p189_p2)  ;;  %v239_v10 = vld [vmem:[%s797_s1 + $0x38] sm:$0xff] (!%p189_p2)  ;;  %v240_v13 = vld [vmem:[%s797_s1 + $0x40] sm:$0xff] (!%p189_p2) }
   0x8   : > { %615 = vmatprep.subr.bf16.mxu0 (!%p189_p2), %v614_v3  ;;  %v626_v12 = vpack.c.bf16 (!%p189_p2), %v239_v10, %v238_v9  ;;  %v241_v14 = vld [vmem:[%s797_s1 + $0x48] sm:$0xff] (!%p189_p2)  ;;  %v242_v16 = vld [vmem:[%s797_s1 + $0x50] sm:$0xff] (!%p189_p2)  ;;  %v243_v17 = vld [vmem:[%s797_s1 + $0x58] sm:$0xff] (!%p189_p2) }
   0x9   : > { %617 = vmatpush3.bf16.msra.mxu0 (!%p189_p2), %v614_v3  ;;  %v630_v15 = vpack.c.bf16 (!%p189_p2), %v241_v14, %v240_v13  ;;  %v634_v18 = vpack.c.bf16 (!%p189_p2), %v243_v17, %v242_v16  ;;  %v244_v19 = vld [vmem:[%s797_s1 + $0x60] sm:$0xff] (!%p189_p2)  ;;  %v245_v20 = vld [vmem:[%s797_s1 + $0x68] sm:$0xff] (!%p189_p2)  ;;  %v246_v22 = vld [vmem:[%s797_s1 + $0x70] sm:$0xff] (!%p189_p2) }
   0xa   : > { %619 = vmatprep.subr.bf16.mxu0 (!%p189_p2), %v618_v5  ;;  %v638_v21 = vpack.c.bf16 (!%p189_p2), %v245_v20, %v244_v19  ;;  %v247_v23 = vld [vmem:[%s797_s1 + $0x78] sm:$0xff] (!%p189_p2)  ;;  %v348_v28 = vld [vmem:[%s799_s3] sm:$0xff] (!%p189_p2)  ;;  %v349_v29 = vld [vmem:[%s799_s3 + $0x8] sm:$0xff] (!%p189_p2) }
   0xb   : > { %v642_v24 = vpack.c.bf16 (!%p189_p2), %v247_v23, %v246_v22  ;;  %v646_v30 = vpack.c.bf16 (!%p189_p2), %v349_v29, %v348_v28  ;;  %v350_v31 = vld [vmem:[%s799_s3 + $0x10] sm:$0xff] (!%p189_p2)  ;;  %v351_v32 = vld [vmem:[%s799_s3 + $0x18] sm:$0xff] (!%p189_p2)  ;;  %v526_v34 = vld [vmem:[%s798_s2] ss:$0 sm:$0xff] (!%p189_p2) }
   0xc   : > { %v650_v33 = vpack.c.bf16 (!%p189_p2), %v351_v32, %v350_v31  ;;  %v527_v51 = vld [vmem:[%s800_s4] ss:$0 sm:$0xff] (!%p189_p2) }
   0xd   : > { %s803_s26 = smov (!%p217_p3, %s522_s26), 7  ;;  %621 = vmatpush3.bf16.msra.mxu0 %v618_v5  ;;  %647 = vmatprep.subr.bf16.mxu1 %v646_v30 }
   0xe   : > { %s523_s8 = sshll.u32 %s803_s26, 3  ;;  %623 = vmatprep.subr.bf16.mxu0 %v622_v8  ;;  %649 = vmatpush3.bf16.msra.mxu1 %v646_v30 }
   0xf   : > { %s740_s15 = scalar_lea.vmem %s796_s0, %s523_s8  ;;  %651 = vmatprep.subr.bf16.mxu1 %v650_v33  ;;  %s226_s25 = scalar_lea.vmem %s801_s5, %s523_s8 }
  0x10   : > { %v228_v11 = vld [vmem:[%s740_s15] sm:$0xff]  ;;  %v229_v25 = vld [vmem:[%s740_s15 + $0x8] sm:$0xff]  ;;  %v230_v26 = vld [vmem:[%s740_s15 + $0x10] sm:$0xff] }
  0x11   : > { %594 = vmatprep.mubr.f32.mxu0 %v228_v11  ;;  %625 = vmatpush3.bf16.msra.mxu0 %v622_v8  ;;  %v231_v27 = vld [vmem:[%s740_s15 + $0x18] sm:$0xff] }
  0x12   : > { %627 = vmatprep.subr.bf16.mxu0 %v626_v12  ;;  %653 = vmatpush3.bf16.msra.mxu1 %v650_v33 }
  0x15   : > { %629 = vmatpush3.bf16.msra.mxu0 %v626_v12 }
  0x16   : > { %631 = vmatprep.subr.bf16.mxu0 %v630_v15 }
  0x19   : > { %633 = vmatpush3.bf16.msra.mxu0 %v630_v15 }
  0x1a   : > { %635 = vmatprep.subr.bf16.mxu0 %v634_v18 }
  0x1d   : > { %637 = vmatpush3.bf16.msra.mxu0 %v634_v18 }
  0x1e   : > { %639 = vmatprep.subr.bf16.mxu0 %v638_v21 }
  0x21   : > { %641 = vmatpush3.bf16.msra.mxu0 %v638_v21 }
  0x22   : > { %643 = vmatprep.subr.bf16.mxu0 %v642_v24 }
  0x25   : > { %645 = vmatpush3.bf16.msra.mxu0 %v642_v24 }
  0x28   : > { %595 = vmatmul.mubr.f32.vlgmr.msra.gmra.mrb[0].mxu0 %v229_v25 }
  0x29   : > { %597 = vmatprep.mubr.f32.mxu0 %v230_v26 }
  0x2c   : > { %598 = vmatmul.mubr.f32.gmra.mrb[2].mxu0 %v231_v27 }
  0xfb   : > { %v596_v35 = vpop.f32.mrb[0].mxu0 }
  0xfc   : > { %v327_v36 = vadd.f32 %v596_v35, %v526_v34  ;;  %v321_v37 = vpop.f32.mrb[1].mxu0 }
  0xfd   : > { %v322_v38 = vadd.f32 %v526_v34, %v321_v37 }
  0xfe   : > { %v341_v39 = vmul.f32 0.01, %v327_v36 }
  0xff   : > { %v340_v40 = vmul.f32 0.01, %v322_v38  ;;  %v599_v41 = vpop.f32.mrb[2].mxu0 }
 0x100   : > { %v337_v42 = vadd.f32 %v599_v41, %v526_v34  ;;  %v331_v43 = vpop.f32.mrb[3].mxu0  ;;  %v345_v46 = vmax.f32 %v327_v36, %v341_v39 }
 0x101   : > { %v332_v44 = vadd.f32 %v526_v34, %v331_v43  ;;  %v344_v45 = vmax.f32 %v322_v38, %v340_v40 }
 0x102   : > { %v343_v47 = vmul.f32 0.01, %v337_v42 }
 0x103   : > { %v342_v48 = vmul.f32 0.01, %v332_v44  ;;  %608 = vmatprep.mubr.msk.f32.mxu1 %vm359_vm0, %v344_v45 }
 0x104   : > { %609 = vmatmul.mubr.msk.f32.vlgmr.msra.gmra.mrb[0].mxu1 %vm359_vm0, %v345_v46  ;;  %v347_v50 = vmax.f32 %v337_v42, %v343_v47 }
 0x105   : > { %v346_v49 = vmax.f32 %v332_v44, %v342_v48 }
 0x107   : > { %611 = vmatprep.mubr.msk.f32.mxu1 %vm359_vm0, %v346_v49 }
 0x108   : > { %612 = vmatmul.mubr.msk.f32.gmra.mrb[2].mxu1 %vm359_vm0, %v347_v50 }
 0x1d7   : > { %v610_v52 = vpop.f32.mrb[0].mxu1 }
 0x1d8   : > { %v438_v53 = vpop.f32.mrb[1].mxu1  ;;  %v444_v55 = vadd.f32 %v610_v52, %v527_v51 }
 0x1d9   : > { %v439_v54 = vadd.f32 %v527_v51, %v438_v53 }
 0x1da   : > { %458 = vst [vmem:[%s226_s25 + $0x8] sm:$0xff] %v444_v55 }
 0x1db   : > { %457 = vst [vmem:[%s226_s25] sm:$0xff] %v439_v54  ;;  %v613_v56 = vpop.f32.mrb[2].mxu1 }
 0x1dc   : > { %v448_v57 = vpop.f32.mrb[3].mxu1  ;;  %v454_v59 = vadd.f32 %v613_v56, %v527_v51 }
 0x1dd   : > { %v449_v58 = vadd.f32 %v527_v51, %v448_v57 }
 0x1de   : > { %460 = vst [vmem:[%s226_s25 + $0x18] sm:$0xff] %v454_v59 }
 0x1df   : > { %459 = vst [vmem:[%s226_s25 + $0x10] sm:$0xff] %v449_v58 }
 0x1e0 PF: > { %s15_s18 = sadd.s32 1, %s668_s18  }
 0x1e1   : > { %p12_p4 = scmp.ge.s32.totalorder %s15_s18, 4  }
 0x1e3   :  { %14 = sbr.rel (!%p12_p4) target bundleno = 1 (0x1), region = 70 }

</bundles_post_ra>
